<compile_context>
chip_gen: v5e
topology: v5e:2x2
jax: 0.10.0
libtpu: 0.0.40
codegen_flags: <defaults>
</compile_context>

<pallas_src>
import functools

import jax
import jax.numpy as jnp
from jax.experimental import pallas as pl
from jax.experimental.pallas import tpu as pltpu


def _round_up(x, m):
    return (x + m - 1) // m * m


def _buf_bytes(rows, cols, itemsize):
    # Conservative VMEM footprint of one buffer holding a (rows, cols) tile:
    # sublanes pad to 8, lanes pad to 128.
    return _round_up(max(rows, 1), 8) * _round_up(max(cols, 1), 128) * itemsize


def _vmem_estimate(tm, d, m, in_itemsize, out_itemsize):
    dbl = 2  # default double-buffering on every pipelined ref
    return dbl * (
        _buf_bytes(tm, d, in_itemsize)        # nodes_fea tile
        + _buf_bytes(tm, 1, 4)                # node-id tile (int32)
        + _buf_bytes(m, d, in_itemsize)       # resident embed_matrix
        + _buf_bytes(2 * d, d, in_itemsize)   # resident fused W^T
        + _buf_bytes(1, d, 4)                 # bias
        + _buf_bytes(tm, d, out_itemsize)     # output tile
    )


def _encoder_kernel(fea_ref, ids_ref, emb_ref, wt_ref, b_ref, out_ref):
    # fea_ref: (tm, D)   aggregated node-feature tile
    # ids_ref: (tm, 1)   int32 node ids tile
    # emb_ref: (M, D)    resident embedding matrix (VMEM)
    # wt_ref:  (2D, D)   resident fused weight = Linear.weight.T
    # b_ref:   (1, D)    bias (f32)
    # out_ref: (tm, D)
    D = out_ref.shape[-1]
    tm = out_ref.shape[0]
    M = emb_ref.shape[0]

    fea = fea_ref[...]
    ids = ids_ref[...]                                        # (tm, 1) int32

    # In-VMEM row gather via exact one-hot matmul on the MXU.
    col = jax.lax.broadcasted_iota(jnp.int32, (tm, M), 1)
    onehot = (ids == col).astype(emb_ref.dtype)               # (tm, M)
    gathered = jnp.dot(onehot, emb_ref[...],
                       precision=jax.lax.Precision.HIGHEST,
                       preferred_element_type=jnp.float32)    # exact row select
    gathered = gathered.astype(fea.dtype)

    # Fused Linear over the (virtual) concatenation: one resident weight ref,
    # sliced in-kernel. Accumulate in f32; bias add / final cast stay f32
    # (v5e-safe even when inputs are bf16).
    acc = jnp.dot(fea, wt_ref[:D, :], preferred_element_type=jnp.float32)
    acc = acc + jnp.dot(gathered, wt_ref[D:, :],
                        preferred_element_type=jnp.float32)
    acc = acc + b_ref[...]
    out_ref[...] = acc.astype(out_ref.dtype)


@functools.partial(jax.jit, static_argnames=("tm", "compute_dtype"))
def encoder_forward(nodes, nodes_fea, embed_matrix, weight, bias, *,
                    tm=1024, compute_dtype=None):
    """Pallas forward for `encoder`.

    nodes:        int32 [N]     node ids
    nodes_fea:    f32   [N, D]  aggregator node features
    embed_matrix: f32   [M, D]  aggregator embedding matrix
    weight:       f32   [D, 2D] nn.Linear weight (out, in)
    bias:         f32   [D]     nn.Linear bias
    compute_dtype: optional (e.g. jnp.bfloat16) to halve HBM traffic on the
                   matmul inputs; accumulation stays f32.
    Returns (cmp_embed_matrix [N, D], nodes_fea [N, D]).
    """
    N, D = nodes_fea.shape
    M = embed_matrix.shape[0]
    out_dtype = nodes_fea.dtype
    in_dtype = jnp.dtype(compute_dtype) if compute_dtype is not None \
        else jnp.dtype(nodes_fea.dtype)

    fea = nodes_fea.astype(in_dtype)
    emb = embed_matrix.astype(in_dtype)
    wt = weight.T.astype(in_dtype)                  # [2D, D] single fused weight
    b2d = bias.reshape(1, D).astype(jnp.float32)

    # --- choose the row tile: as large as possible within a chip-safe VMEM
    # budget (48 MiB fits inside v7x's 64 MiB physical VMEM with headroom;
    # trivially fine on v5e/v6e's 128 MiB).
    vmem_budget = 48 * 1024 * 1024
    in_isz = jnp.dtype(in_dtype).itemsize
    out_isz = jnp.dtype(out_dtype).itemsize
    tm = max(8, min(_round_up(tm, 8), _round_up(N, 8)))
    while tm > 8 and _vmem_estimate(tm, D, M, in_isz, out_isz) > vmem_budget:
        tm = max(8, _round_up(tm // 2, 8))

    # --- pad the tail so no rows are dropped when N % tm != 0.
    N_pad = _round_up(N, tm)
    ids = nodes.astype(jnp.int32)
    if N_pad != N:
        fea = jnp.pad(fea, ((0, N_pad - N), (0, 0)))
        ids = jnp.pad(ids, (0, N_pad - N))          # padded rows gather row 0
    ids2d = ids.reshape(N_pad, 1)

    vmem_limit = int(min(
        60 * 1024 * 1024,
        max(_vmem_estimate(tm, D, M, in_isz, out_isz) + (8 << 20),
            32 * 1024 * 1024)))

    grid = (N_pad // tm,)
    out = pl.pallas_call(
        _encoder_kernel,
        out_shape=jax.ShapeDtypeStruct((N_pad, D), out_dtype),
        grid_spec=pltpu.PrefetchScalarGridSpec(
            num_scalar_prefetch=0,
            grid=grid,
            in_specs=[
                pl.BlockSpec((tm, D), lambda i: (i, 0)),     # nodes_fea tile
                pl.BlockSpec((tm, 1), lambda i: (i, 0)),     # node ids tile
                pl.BlockSpec((M, D), lambda i: (0, 0)),      # embed_matrix (resident)
                pl.BlockSpec((2 * D, D), lambda i: (0, 0)),  # fused W^T (resident)
                pl.BlockSpec((1, D), lambda i: (0, 0)),      # bias
            ],
            out_specs=pl.BlockSpec((tm, D), lambda i: (i, 0)),
        ),
        compiler_params=pltpu.CompilerParams(
            # Independent row axis -> shards across the 2 TensorCores on v7x.
            dimension_semantics=("parallel",),
            vmem_limit_bytes=vmem_limit,
        ),
    )(fea, ids2d, emb, wt, b2d)

    if N_pad != N:
        out = out[:N]
    return out, nodes_fea


def _reference(nodes, nodes_fea, embed_matrix, weight, bias):
    combined = jnp.concatenate([nodes_fea, embed_matrix[nodes]], axis=1)
    return combined @ weight.T + bias


if __name__ == "__main__":
    # Small, deterministic setup consistent with the module:
    #   embed_dim D = 32, N = 8 query nodes, M = 16 rows in embed_matrix.
    D = 32
    N = 8
    M = 16

    key = jax.random.PRNGKey(0)
    k_fea, k_emb, k_w, k_b, k_idx = jax.random.split(key, 5)

    # Synthetic deterministic "aggregator" outputs.
    nodes_fea = jax.random.normal(k_fea, (N, D), dtype=jnp.float32)
    embed_matrix = jax.random.normal(k_emb, (M, D), dtype=jnp.float32)
    nodes_u = jax.random.randint(k_idx, (N,), 0, M, dtype=jnp.int32)

    # Deterministic nn.Linear(2D -> D) parameters (uniform like torch default).
    bound = 1.0 / jnp.sqrt(2.0 * D)
    weight = jax.random.uniform(k_w, (D, 2 * D), dtype=jnp.float32,
                                minval=-bound, maxval=bound)
    bias = jax.random.uniform(k_b, (D,), dtype=jnp.float32,
                              minval=-bound, maxval=bound)

    cmp_embed, fea_out = encoder_forward(nodes_u, nodes_fea, embed_matrix,
                                         weight, bias)
    cmp_embed = jax.block_until_ready(cmp_embed)
    fea_out = jax.block_until_ready(fea_out)

    ref = _reference(nodes_u, nodes_fea, embed_matrix, weight, bias)
    assert cmp_embed.shape == (N, D)
    assert fea_out.shape == (N, D)
    assert jnp.allclose(cmp_embed, ref, atol=1e-5, rtol=1e-5)
    assert jnp.allclose(fea_out, nodes_fea)

    print("KERNEL_OK")
</pallas_src>

<mosaic_0001>
module attributes {stable_mosaic.version = 11 : i64} {
  func.func @_encoder_kernel(%arg0: i32, %arg1: memref<8x32xf32, #tpu.memory_space<vmem>>, %arg2: memref<8x1xi32, #tpu.memory_space<vmem>>, %arg3: memref<16x32xf32, #tpu.memory_space<vmem>>, %arg4: memref<64x32xf32, #tpu.memory_space<vmem>>, %arg5: memref<1x32xf32, #tpu.memory_space<vmem>>, %arg6: memref<8x32xf32, #tpu.memory_space<vmem>>) attributes {dimension_semantics = [#tpu.dimension_semantics<parallel>], iteration_bounds = array<i64: 1>, scalar_prefetch = 0 : i64, scratch_operands = 0 : i64, tpu.core_type = #tpu.core_type<tc>, window_params = [{transform_indices = @transform_0, window_bounds = array<i64: 8, 32>}, {transform_indices = @transform_1, window_bounds = array<i64: 8, 1>}, {pipeline_mode = #tpu.pipeline_mode<synchronous>, transform_indices = @transform_2, window_bounds = array<i64: 16, 32>}, {pipeline_mode = #tpu.pipeline_mode<synchronous>, transform_indices = @transform_3, window_bounds = array<i64: 64, 32>}, {pipeline_mode = #tpu.pipeline_mode<synchronous>, transform_indices = @transform_4, window_bounds = array<i64: 1, 32>}, {transform_indices = @transform_5, window_bounds = array<i64: 8, 32>}]} {
    %c0 = arith.constant 0 : index
    %c0_0 = arith.constant 0 : index
    %0 = vector.load %arg1[%c0, %c0_0] : memref<8x32xf32, #tpu.memory_space<vmem>>, vector<8x32xf32>
    %c0_1 = arith.constant 0 : index
    %c0_2 = arith.constant 0 : index
    %1 = vector.load %arg2[%c0_1, %c0_2] : memref<8x1xi32, #tpu.memory_space<vmem>>, vector<8x1xi32>
    %2 = tpu.iota {dimensions = array<i32: 1>} : vector<8x16xi32>
    %3 = vector.broadcast %1 : vector<8x1xi32> to vector<8x16xi32>
    %4 = arith.cmpi eq, %3, %2 : vector<8x16xi32>
    %5 = arith.extui %4 : vector<8x16xi1> to vector<8x16xi32>
    %6 = arith.sitofp %5 : vector<8x16xi32> to vector<8x16xf32>
    %c0_3 = arith.constant 0 : index
    %c0_4 = arith.constant 0 : index
    %7 = vector.load %arg3[%c0_3, %c0_4] : memref<16x32xf32, #tpu.memory_space<vmem>>, vector<16x32xf32>
    %cst = arith.constant dense<0.000000e+00> : vector<8x32xf32>
    %8 = tpu.matmul %6, %7, %cst {dimension_numbers = #tpu.dot_dimension_numbers<[1], [0], [0], [1], [0, 0, 1, 1], [], []>, precision = #tpu.contract_precision<fp32>} : vector<8x16xf32>, vector<16x32xf32>, vector<8x32xf32> -> vector<8x32xf32>
    %c0_5 = arith.constant 0 : index
    %c0_6 = arith.constant 0 : index
    %9 = vector.load %arg4[%c0_5, %c0_6] : memref<64x32xf32, #tpu.memory_space<vmem>>, vector<32x32xf32>
    %cst_7 = arith.constant dense<0.000000e+00> : vector<8x32xf32>
    %10 = tpu.matmul %0, %9, %cst_7 {dimension_numbers = #tpu.dot_dimension_numbers<[1], [0], [0], [1], [0, 0, 1, 1], [], []>} : vector<8x32xf32>, vector<32x32xf32>, vector<8x32xf32> -> vector<8x32xf32>
    %c32 = arith.constant 32 : index
    %c0_8 = arith.constant 0 : index
    %11 = vector.load %arg4[%c32, %c0_8] : memref<64x32xf32, #tpu.memory_space<vmem>>, vector<32x32xf32>
    %cst_9 = arith.constant dense<0.000000e+00> : vector<8x32xf32>
    %12 = tpu.matmul %8, %11, %cst_9 {dimension_numbers = #tpu.dot_dimension_numbers<[1], [0], [0], [1], [0, 0, 1, 1], [], []>} : vector<8x32xf32>, vector<32x32xf32>, vector<8x32xf32> -> vector<8x32xf32>
    %13 = arith.addf %10, %12 : vector<8x32xf32>
    %c0_10 = arith.constant 0 : index
    %c0_11 = arith.constant 0 : index
    %14 = vector.load %arg5[%c0_10, %c0_11] : memref<1x32xf32, #tpu.memory_space<vmem>>, vector<1x32xf32>
    %15 = vector.broadcast %14 : vector<1x32xf32> to vector<8x32xf32>
    %16 = arith.addf %13, %15 : vector<8x32xf32>
    %c0_12 = arith.constant 0 : index
    %c0_13 = arith.constant 0 : index
    %17 = vector.load %arg6[%c0_12, %c0_13] : memref<8x32xf32, #tpu.memory_space<vmem>>, vector<8x32xf32>
    tpu.vector_store %arg6[%c0_12, %c0_13], %16 {strides = array<i32>} : memref<8x32xf32, #tpu.memory_space<vmem>>, vector<8x32xf32>,
    return
  }
  func.func @transform_0(%arg0: i32) -> (i32, i32) {
    %c0_i32 = arith.constant 0 : i32
    %c0_i32_0 = arith.constant 0 : i32
    return %arg0, %c0_i32 : i32, i32
  }
  func.func @transform_1(%arg0: i32) -> (i32, i32) {
    %c0_i32 = arith.constant 0 : i32
    %c0_i32_0 = arith.constant 0 : i32
    return %arg0, %c0_i32 : i32, i32
  }
  func.func @transform_2(%arg0: i32) -> (i32, i32) {
    %c0_i32 = arith.constant 0 : i32
    %c0_i32_0 = arith.constant 0 : i32
    %c0_i32_1 = arith.constant 0 : i32
    return %c0_i32, %c0_i32_0 : i32, i32
  }
  func.func @transform_3(%arg0: i32) -> (i32, i32) {
    %c0_i32 = arith.constant 0 : i32
    %c0_i32_0 = arith.constant 0 : i32
    %c0_i32_1 = arith.constant 0 : i32
    return %c0_i32, %c0_i32_0 : i32, i32
  }
  func.func @transform_4(%arg0: i32) -> (i32, i32) {
    %c0_i32 = arith.constant 0 : i32
    %c0_i32_0 = arith.constant 0 : i32
    %c0_i32_1 = arith.constant 0 : i32
    return %c0_i32, %c0_i32_0 : i32, i32
  }
  func.func @transform_5(%arg0: i32) -> (i32, i32) {
    %c0_i32 = arith.constant 0 : i32
    %c0_i32_0 = arith.constant 0 : i32
    return %arg0, %c0_i32 : i32, i32
  }
}

</mosaic_0001>

<bundles_post_ra>
// kernel: encoder_forward.1
= control target key start
LH: loop header
LB: loop body
LE: loop exit
PB: predicated region body
PF: predicated region fallthrough
CT: control target
= control target key end

     0   :  { %v310_v2 = vmov 0   ;;  %s388_s0 = inlined_call_operand.vmem [shape: f32[8,32], index: 0, kind: input, shape index: {}]   ;;  %s389_s1 = inlined_call_operand.vmem [shape: s32[8,1], index: 1, kind: input, shape index: {}]   ;;  %s390_s2 = inlined_call_operand.vmem [shape: f32[16,32], index: 2, kind: input, shape index: {}]   ;;  %s391_s3 = inlined_call_operand.vmem [shape: f32[64,32], index: 3, kind: input, shape index: {}]   ;;  %s392_s4 = inlined_call_operand.vmem [shape: f32[1,32], index: 4, kind: input, shape index: {}]   ;;  %s393_s5 = inlined_call_operand.hbm [shape: f32[8,32], index: 5, kind: output, shape index: {}]  }
   0x1   :  { %v22_v0 = vld [vmem:[%s389_s1] sm:$0xff]  ;;  %v32_v1 = vld [vmem:[%s390_s2 + $0x8] sm:$0xff]  ;;  %282 = vset.pattern.permute.xlu0 %v310_v2 }
   0x2   :  { %v51_v3 = vand.u32 4294901760, %v32_v1 }
   0x3   :  { %10 = vsyncpa [#allocation3], 0  ;;  %26 = vperm.xlu0 %282, %v22_v0   ;;  %v31_v8 = vld [vmem:[%s390_s2] sm:$0xff]  ;;  %v23_v14 = vlaneseq  ;;  %vm33_vm0 = vcmask 130048   ;;  %v311_v17 = vmov 0.0   ;;  %v203_v24 = vld [vmem:[%s391_s3 + $0x38] sm:$0xff] }
   0x4   :  { %v79_v4 = vsub.f32 %v32_v1, %v51_v3  ;;  %136 = vmatpush.msra.mxu3 %v51_v3  ;;  %52 = vmatpush.msra.mxu0 %v51_v3  ;;  %v53_v9 = vand.u32 4294901760, %v31_v8  ;;  %v199_v25 = vld [vmem:[%s391_s3 + $0x18] sm:$0xff]  ;;  %v202_v26 = vld [vmem:[%s391_s3 + $0x30] sm:$0xff]  ;;  %v201_v28 = vld [vmem:[%s391_s3 + $0x28] sm:$0xff]  ;;  %vm204_vm2 = vcmask 261120   ;;  %s264_s19 = sshll.u32 %s393_s5, 4  ;;  %s265_s19 = int_to_ptr.hbm [resolvable:$true] %s264_s19 }
   0x5   :  { %v24_v15 = vand.u32 127, %v23_v14  ;;  %v198_v27 = vld [vmem:[%s391_s3 + $0x10] sm:$0xff]  ;;  %v197_v29 = vld [vmem:[%s391_s3 + $0x8] sm:$0xff]  ;;  %v200_v30 = vld [vmem:[%s391_s3 + $0x20] sm:$0xff] }
   0x6   :  { %v80_v5 = vand.u32 4294901760, %v79_v4  ;;  %111 = vmatpush.msra.mxu2 %v79_v4  ;;  %v85_v10 = vsub.f32 %v31_v8, %v53_v9  ;;  %138 = vmatpush.msra.mxu3 %v53_v9  ;;  %v196_v31 = vld [vmem:[%s391_s3] sm:$0xff] }
   0x7   :  { %54 = vmatpush.msra.mxu0 %v53_v9  ;;  %v21_v32 = vld [vmem:[%s388_s0] sm:$0xff]  ;;  %s312_s0 = smov [#allocation2]  }
   0x8   :  { %v81_v6 = vsub.f32 %v79_v4, %v80_v5  ;;  %v86_v11 = vand.u32 4294901760, %v85_v10  ;;  %114 = vmatpush.msra.mxu2 %v85_v10  ;;  %243 = vmatpush.msrb.mxu3 %v199_v25  ;;  %v283_v45 = vld [vmem:[%s392_s4] ss:$0 sm:$0xff]  ;;  %s262_s16 = sshll.u32 %s312_s0, 4  ;;  %s263_s16 = int_to_ptr.vmem [resolvable:$true] %s262_s16 }
   0x9   :  { %163 = vmatpush.msrb.mxu0 %v80_v5 }
   0xa   :  { %v82_v7 = vand.u32 4294901760, %v81_v6  ;;  %v87_v12 = vsub.f32 %v85_v10, %v86_v11  ;;  %220 = vmatpush.msrb.mxu2 %v203_v24  ;;  %244 = vmatpush.msrb.mxu3 %v198_v27 }
   0xb   :  { %167 = vmatpush.msrb.mxu0 %v86_v11 }
   0xc   :  { %83 = vmatpush.msra.mxu1 %v82_v7  ;;  %v88_v13 = vand.u32 4294901760, %v87_v12  ;;  %221 = vmatpush.msrb.mxu2 %v202_v26 }
   0xd   :  { %245 = vmatpush.msrb.mxu3 %v197_v29 }
   0xe   :  { %89 = vmatpush.msra.mxu1 %v88_v13  ;;  %222 = vmatpush.msrb.mxu2 %v201_v28 }
   0xf   :  { %246 = vmatpush.msrb.mxu3 %v196_v31 }
  0x10   :  { %188 = vmatpush.msrb.mxu1 %v51_v3  ;;  %223 = vmatpush.msrb.mxu2 %v200_v30 }
  0x12   :  { %190 = vmatpush.msrb.mxu1 %v53_v9 }
  0x75   :  { %v27_v16 = vpop.permute.xlu0 %26 }
  0x76   :  { %vm28_vm1 = vcmp.eq.s32.totalorder %v27_v16, %v24_v15 }
  0x77   :  { %v273_v18 = vsel %vm28_vm1, 1.0, %v311_v17 }
  0x78   :  { %274 = vmatmul.msk.f32.vlgmr.msra.gmra.mxu1 %vm33_vm0, %v273_v18  ;;  %v35_v19 = vsel %vm33_vm0, %v273_v18, 0 }
  0x79   :  { %v56_v20 = vsub.f32 %v35_v19, %v35_v19 }
  0x7b   :  { %117 = vmatmul.f32.vlgmr.msra.gmra.mxu2 %v56_v20  ;;  %v57_v21 = vand.u32 4294901760, %v56_v20 }
  0x7d   :  { %142 = vmatmul.f32.vlgmr.msra.gmra.mxu3 %v57_v21  ;;  %v58_v22 = vsub.f32 %v56_v20, %v57_v21 }
  0x7f   :  { %v59_v23 = vand.u32 4294901760, %v58_v22 }
  0x80   :  { %276 = vmatmul.msk.f32.vlgmr.msrb.gmra.mxu1 %vm33_vm0, %v273_v18 }
  0x81   :  { %60 = vmatmul.f32.vlgmr.msra.gmra.mxu0 %v59_v23 }
  0x85   :  { %278 = vmatmul.msk.f32.vlgmr.msrb.gmra.mxu3 %vm204_vm2, %v21_v32 }
  0x89   :  { %275 = vmatmul.msk.f32.vlgmr.msrb.gmra.mxu0 %vm33_vm0, %v273_v18 }
  0xf5   :  { %v92_v33 = vpop.f32.mrf.mxu1 }
  0xfd   :  { %v193_v42 = vpop.f32.mrf.mxu1 }
  0xfe   :  { %v61_v34 = vpop.f32.mrf.mxu0  ;;  %v118_v36 = vpop.f32.mrf.mxu2 }
  0xff   :  { %v93_v35 = vadd.f32 %v92_v33, %v61_v34 }
 0x100   :  { %v143_v38 = vpop.f32.mrf.mxu3 }
 0x101   :  { %v119_v37 = vadd.f32 %v118_v36, %v93_v35 }
 0x103   :  { %v144_v39 = vadd.f32 %v143_v38, %v119_v37 }
 0x106   :  { %v170_v40 = vpop.f32.mrf.mxu0 }
 0x107   :  { %v171_v41 = vadd.f32 %v170_v40, %v144_v39 }
 0x108   :  { %v248_v44 = vpop.f32.mrf.mxu3 }
 0x109   :  { %v194_v43 = vadd.f32 %v193_v42, %v171_v41 }
 0x10b   :  { %277 = vmatmul.msk.f32.vlgmr.msrb.gmra.mxu2 %vm204_vm2, %v194_v43 }
 0x18e   :  { %v225_v46 = vpop.f32.mrf.mxu2 }
 0x18f   :  { %v249_v47 = vadd.f32 %v248_v44, %v225_v46 }
 0x191   :  { %v255_v48 = vadd.f32 %v283_v45, %v249_v47 }
 0x193   :  { %256 = vst.msk [vmem:[#allocation2] sm:$0xff] %vm204_vm2, %v255_v48 }
 0x194   :  { %267 = dma.vmem_to_hbm [thread:$0]  %s263_s16, 128, %s265_s19, [#allocation3]  }
 0x195   :  { %308 = dma.done.wait [#allocation3], 128  }
 0x196   :  { %309 = vsyncadd [#allocation3], 4294967168 }
 0x197   :  { %272 = vsyncpa [#allocation3], 1 }

</bundles_post_ra>
